<compile_context>
chip_gen: v5e
topology: v5e:2x2
jax: 0.10.0
libtpu: 0.0.40
codegen_flags: <defaults>
</compile_context>

<pallas_src>
import functools

import jax
import jax.numpy as jnp
from jax.experimental import pallas as pl
from jax.experimental.pallas import tpu as pltpu


def _round_up(x, m):
    return (x + m - 1) // m * m


_MAX_TK = 4608          # largest single-step K (layer4: 9*512) -> nk == 1 everywhere
CH_MIN = 128            # pad narrow channel dims to 128 so output tiles are lane-dense
_VMEM_LIMIT = 48 * 1024 * 1024   # fits v7x's 64 MiB/TC with headroom; fine on v5e/v6e


# ----------------------------------------------------------------------------
# Pallas kernels
# ----------------------------------------------------------------------------
def _mm_bias_act_kernel(x_ref, w_ref, b_ref, o_ref, *, relu):
    """Single K-step: o = act(x @ w + bias). No accumulator scratch."""
    y = jnp.dot(x_ref[...], w_ref[...], preferred_element_type=jnp.float32)
    y = y + b_ref[...]
    if relu:
        y = jnp.maximum(y, 0.0)
    o_ref[...] = y.astype(o_ref.dtype)


def _mm_bias_act_res_kernel(x_ref, w_ref, b_ref, r_ref, o_ref, *, relu):
    """Single K-step: o = act(x @ w + bias + residual). No accumulator scratch."""
    y = jnp.dot(x_ref[...], w_ref[...], preferred_element_type=jnp.float32)
    y = y + b_ref[...] + r_ref[...].astype(jnp.float32)
    if relu:
        y = jnp.maximum(y, 0.0)
    o_ref[...] = y.astype(o_ref.dtype)


def _mm_bias_act_multi_kernel(x_ref, w_ref, b_ref, o_ref, acc_ref, *, relu):
    """Generic multi-K-step path (not hit by this network; kept for generality)."""
    @pl.when(pl.program_id(2) == 0)
    def _():
        acc_ref[...] = jnp.zeros_like(acc_ref)

    acc_ref[...] += jnp.dot(x_ref[...], w_ref[...],
                            preferred_element_type=jnp.float32)

    @pl.when(pl.program_id(2) == pl.num_programs(2) - 1)
    def _():
        y = acc_ref[...] + b_ref[...]
        if relu:
            y = jnp.maximum(y, 0.0)
        o_ref[...] = y.astype(o_ref.dtype)


def _mm_bias_act_res_multi_kernel(x_ref, w_ref, b_ref, r_ref, o_ref, acc_ref, *, relu):
    @pl.when(pl.program_id(2) == 0)
    def _():
        acc_ref[...] = jnp.zeros_like(acc_ref)

    acc_ref[...] += jnp.dot(x_ref[...], w_ref[...],
                            preferred_element_type=jnp.float32)

    @pl.when(pl.program_id(2) == pl.num_programs(2) - 1)
    def _():
        y = acc_ref[...] + b_ref[...] + r_ref[...].astype(jnp.float32)
        if relu:
            y = jnp.maximum(y, 0.0)
        o_ref[...] = y.astype(o_ref.dtype)


def _fc_bn_l2norm_kernel(x_ref, w_ref, b_ref, o_ref):
    """Fused: y = x @ fc_w + bn_bias; o = y / ||y||_2 (rows). Single output tile."""
    y = jnp.dot(x_ref[...], w_ref[...], preferred_element_type=jnp.float32)
    y = y + b_ref[...]
    ss = jnp.sum(y * y, axis=1, keepdims=True)
    inv = jax.lax.rsqrt(jnp.maximum(ss, 1e-24))      # EUP rsqrt (no sqrt + divide)
    o_ref[...] = (y * inv).astype(o_ref.dtype)


def _l2norm_kernel(x_ref, o_ref):
    x = x_ref[...].astype(jnp.float32)
    ss = jnp.sum(x * x, axis=1, keepdims=True)
    inv = jax.lax.rsqrt(jnp.maximum(ss, 1e-24))
    o_ref[...] = (x * inv).astype(o_ref.dtype)


# ----------------------------------------------------------------------------
# Pallas wrappers
# ----------------------------------------------------------------------------
def _pick_tk(K):
    if K <= _MAX_TK:
        return K
    best = 128
    d = 256
    while d <= _MAX_TK:
        if K % d == 0:
            best = d
        d += 128
    return best


@functools.partial(jax.jit, static_argnames=("relu", "out_dtype"))
def fused_matmul(x, w, bias, residual=None, *, relu=True, out_dtype=jnp.bfloat16):
    """y = act((x @ w) + bias [+ residual]).

    x: (M, K) bf16, w: (K, N) bf16 (BN scale pre-folded, K a 128-multiple, N a
    128-multiple in this network), bias: (1, N) f32.  MXU accumulates in f32.
    """
    M, K = x.shape
    Kw, N = w.shape
    assert K == Kw and K % 128 == 0, (K, Kw)

    tk = _pick_tk(K)
    nk = K // tk

    # M tiling: big tiles on shallow small-K layers; 512 when K is large so the
    # double-buffered working set stays < ~24 MiB (v7x has 64 MiB VMEM per TC).
    tm_cap = 1024 if tk <= 1536 else 512
    Mp = _round_up(M, 8)
    tm = min(tm_cap, Mp)
    gm = pl.cdiv(Mp, tm)

    # N tiling: lane-dense. tn=512 only when >=2 M tiles (keeps a >=2-tile parallel
    # sub-grid so both v7x TensorCores get work; also keeps layer4 weights resident).
    if N % 512 == 0 and gm >= 2:
        tn = 512
    elif N % 256 == 0:
        tn = 256
    elif N % 128 == 0:
        tn = 128
    else:
        tn = N            # lane-sparse fallback — not hit by this network
    gn = N // tn

    x = x.astype(jnp.bfloat16)
    if Mp != M:           # only a handful of rows; never a full extra HBM pass
        x = jnp.pad(x, ((0, Mp - M), (0, 0)))

    args = [x, w.astype(jnp.bfloat16), bias.astype(jnp.float32)]
    r = None
    if residual is not None:
        r = residual.astype(jnp.bfloat16)
        if Mp != M:
            r = jnp.pad(r, ((0, Mp - M), (0, 0)))

    if nk == 1:
        # --- fast path: no accumulator scratch, 2-D grid ---
        grid = (gm, gn)
        in_specs = [pl.BlockSpec((tm, tk), lambda i, j: (i, 0)),
                    pl.BlockSpec((tk, tn), lambda i, j: (0, j)),
                    pl.BlockSpec((1, tn), lambda i, j: (0, j))]
        out_spec = pl.BlockSpec((tm, tn), lambda i, j: (i, j))
        scratch = []
        semantics = ("parallel", "parallel")
        if r is not None:
            in_specs.append(pl.BlockSpec((tm, tn), lambda i, j: (i, j)))
            args.append(r)
            kernel = functools.partial(_mm_bias_act_res_kernel, relu=relu)
        else:
            kernel = functools.partial(_mm_bias_act_kernel, relu=relu)
    else:
        # --- generic multi-K path with f32 accumulator ---
        grid = (gm, gn, nk)
        in_specs = [pl.BlockSpec((tm, tk), lambda i, j, k: (i, k)),
                    pl.BlockSpec((tk, tn), lambda i, j, k: (k, j)),
                    pl.BlockSpec((1, tn), lambda i, j, k: (0, j))]
        out_spec = pl.BlockSpec((tm, tn), lambda i, j, k: (i, j))
        scratch = [pltpu.VMEM((tm, tn), jnp.float32)]
        semantics = ("parallel", "parallel", "arbitrary")
        if r is not None:
            in_specs.append(pl.BlockSpec((tm, tn), lambda i, j, k: (i, j)))
            args.append(r)
            kernel = functools.partial(_mm_bias_act_res_multi_kernel, relu=relu)
        else:
            kernel = functools.partial(_mm_bias_act_multi_kernel, relu=relu)

    out = pl.pallas_call(
        kernel,
        out_shape=jax.ShapeDtypeStruct((Mp, N), out_dtype),
        grid=grid,
        in_specs=in_specs,
        out_specs=out_spec,
        scratch_shapes=scratch,
        compiler_params=pltpu.CompilerParams(
            dimension_semantics=semantics,
            vmem_limit_bytes=_VMEM_LIMIT),
    )(*args)
    if Mp != M:
        out = out[:M]
    return out


@jax.jit
def l2_normalize(x):
    """F.normalize(x, p=2, dim=1) for x of shape (B, D). Fallback path."""
    B, D = x.shape
    Bp, Dp = _round_up(B, 8), _round_up(D, 128)
    xp = jnp.pad(x, ((0, Bp - B), (0, Dp - D)))   # zero cols don't change row norms
    out = pl.pallas_call(
        _l2norm_kernel,
        out_shape=jax.ShapeDtypeStruct((Bp, Dp), x.dtype),
    )(xp)
    return out[:B, :D]


@jax.jit
def fc_embed_l2(feat, fc_w, fc_bias):
    """L2-normalized(BN(feat @ fc_w)): fc GEMM + folded BatchNorm1d + L2 fused."""
    B, K = feat.shape
    Kw, N = fc_w.shape
    assert K == Kw
    if K % 128 != 0 or N % 128 != 0 or N > 4096:
        emb = fused_matmul(feat.astype(jnp.bfloat16), fc_w, fc_bias,
                           relu=False, out_dtype=jnp.float32)
        return l2_normalize(emb)
    Bp = _round_up(B, 8)
    x = feat.astype(jnp.bfloat16)
    if Bp != B:
        x = jnp.pad(x, ((0, Bp - B), (0, 0)))
    out = pl.pallas_call(
        _fc_bn_l2norm_kernel,
        out_shape=jax.ShapeDtypeStruct((Bp, N), jnp.float32),
    )(x, fc_w.astype(jnp.bfloat16), fc_bias.astype(jnp.float32))
    return out[:B]


# ----------------------------------------------------------------------------
# Plain-JAX glue: im2col, max-pool (not the hot path)
# ----------------------------------------------------------------------------
def im2col(x, kh, kw, stride, padding):
    # TODO(synk): the kh*kw tap gather is still materialized in HBM; fusing the taps
    # into the matmul K reduction would cut activation read/write traffic further.
    if padding:
        x = jnp.pad(x, ((0, 0), (padding, padding), (padding, padding), (0, 0)))
    B, H, W, C = x.shape
    oh = (H - kh) // stride + 1
    ow = (W - kw) // stride + 1
    cols = [x[:, i:i + stride * oh:stride, j:j + stride * ow:stride, :]
            for i in range(kh) for j in range(kw)]
    K = kh * kw * C
    Kp = _round_up(K, 128)
    if Kp != K:   # pad K to a 128 multiple inside the same concat (matches weights)
        cols.append(jnp.zeros((B, oh, ow, Kp - K), x.dtype))
    patches = jnp.concatenate(cols, axis=-1)        # (B, oh, ow, Kp)
    return patches.reshape(B * oh * ow, Kp), (B, oh, ow)


@jax.jit
def maxpool_3x3_s2_p1(x):
    """Single-pass windowed max (reads conv1 output once, not 9 times)."""
    neg_inf = jnp.asarray(-jnp.inf, dtype=x.dtype)
    return jax.lax.reduce_window(
        x, neg_inf, jax.lax.max,
        window_dimensions=(1, 3, 3, 1),
        window_strides=(1, 2, 2, 1),
        padding=((0, 0), (1, 1), (1, 1), (0, 0)))


# ----------------------------------------------------------------------------
# Parameter construction (deterministic, synthetic)
# ----------------------------------------------------------------------------
def bn_fold(gamma, beta, mean, var, eps):
    scale = gamma / jnp.sqrt(var + eps)
    return scale, beta - mean * scale


def make_conv_bn(key, cin, cout, k, *, cin_width=None, cout_width=None, eps=1e-5):
    """Conv(k x k, cin->cout) + folded BN, laid out for im2col GEMM.

    cin_width/cout_width >= cin/cout: zero-padded channel widths so that activations
    carried through the narrow (64-ch) part of the net are 128-wide (lane-dense).
    """
    cin_width = cin if cin_width is None else cin_width
    cout_width = cout if cout_width is None else cout_width
    fan_in = cin * k * k
    w = jax.random.normal(key, (k, k, cin, cout), jnp.float32) * (2.0 / fan_in) ** 0.5
    gamma = jnp.ones((cout,), jnp.float32)
    beta = jnp.zeros((cout,), jnp.float32)
    scale, bias = bn_fold(gamma, beta, jnp.zeros((cout,), jnp.float32),
                          jnp.ones((cout,), jnp.float32), eps)
    w = w * scale[None, None, None, :]              # fold BN scale into weight columns
    wz = jnp.zeros((k, k, cin_width, cout_width), jnp.float32)
    wz = wz.at[:, :, :cin, :cout].set(w)            # padded in/out channels are zero
    wz = wz.reshape(k * k * cin_width, cout_width)
    K = k * k * cin_width
    Kp = _round_up(K, 128)
    if Kp != K:
        wz = jnp.pad(wz, ((0, Kp - K), (0, 0)))     # pre-pad K once, at init
    bias_full = jnp.zeros((cout_width,), jnp.float32).at[:cout].set(bias)
    return dict(w=wz.astype(jnp.bfloat16), bias=bias_full.reshape(1, cout_width),
                kh=k, kw=k)


def make_layer(key, inplanes, planes, blocks, stride, in_width):
    out_width = max(planes, CH_MIN)
    params = []
    for b in range(blocks):
        key, k1, k2, k3 = jax.random.split(key, 4)
        s = stride if b == 0 else 1
        p = dict(
            conv1=make_conv_bn(k1, inplanes, planes, 3,
                               cin_width=in_width, cout_width=out_width),
            conv2=make_conv_bn(k2, planes, planes, 3,
                               cin_width=out_width, cout_width=out_width),
            stride=s,
        )
        if b == 0 and (s != 1 or inplanes != planes):
            p["downsample"] = make_conv_bn(k3, inplanes, planes, 1,
                                           cin_width=in_width, cout_width=out_width)
        params.append(p)
        inplanes = planes
        in_width = out_width
    return params, inplanes, out_width, key


def init_resnet34_center_params(key, num_classes=10, embedding_dimension=256):
    params = {}
    key, k1 = jax.random.split(key)
    params["conv1"] = make_conv_bn(k1, 3, 64, 7, cin_width=3, cout_width=CH_MIN)
    inplanes, width = 64, CH_MIN
    for name, planes, blocks, stride in (("layer1", 64, 3, 1),
                                         ("layer2", 128, 4, 2),
                                         ("layer3", 256, 6, 2),
                                         ("layer4", 512, 3, 2)):
        blks, inplanes, width, key = make_layer(key, inplanes, planes, blocks,
                                                stride, width)
        params[name] = blks

    key, kfc, kg, kb, kc, kcb = jax.random.split(key, 6)
    emb = embedding_dimension
    # fc = Linear(512, emb, bias=False) followed by BatchNorm1d(emb, eps=0.001)
    fc_w = jax.random.normal(kfc, (inplanes, emb), jnp.float32) * (1.0 / inplanes) ** 0.5
    gamma = 1.0 + 0.1 * jax.random.normal(kg, (emb,), jnp.float32)
    beta = 0.05 * jax.random.normal(kb, (emb,), jnp.float32)
    fc_scale, fc_bias = bn_fold(gamma, beta, jnp.zeros((emb,), jnp.float32),
                                jnp.ones((emb,), jnp.float32), 0.001)
    params["fc_w"] = (fc_w * fc_scale[None, :]).astype(jnp.bfloat16)
    params["fc_bias"] = fc_bias.reshape(1, emb).astype(jnp.float32)

    # classifier = Linear(emb, num_classes); N zero-padded to 128 (lane-dense stores),
    # logits are sliced back to num_classes after the GEMM.
    ncls_pad = _round_up(max(num_classes, CH_MIN), 128)
    cls_w = jax.random.normal(kc, (emb, num_classes), jnp.float32) * (1.0 / emb) ** 0.5
    cls_b = 0.01 * jax.random.normal(kcb, (num_classes,), jnp.float32)
    params["cls_w"] = jnp.zeros((emb, ncls_pad), jnp.float32) \
        .at[:, :num_classes].set(cls_w).astype(jnp.bfloat16)
    params["cls_b"] = jnp.zeros((1, ncls_pad), jnp.float32) \
        .at[0, :num_classes].set(cls_b)
    params["num_classes"] = num_classes
    return params


# ----------------------------------------------------------------------------
# Forward pass
# ----------------------------------------------------------------------------
@functools.partial(jax.jit,
                   static_argnames=("kh", "kw", "stride", "padding", "relu", "out_dtype"))
def _conv_bn_impl(x, w, bias, residual, *, kh, kw, stride, padding, relu, out_dtype):
    cols, (B, oh, ow) = im2col(x, kh, kw, stride, padding)
    res2d = residual.reshape(B * oh * ow, -1) if residual is not None else None
    y = fused_matmul(cols, w, bias, res2d, relu=relu, out_dtype=out_dtype)
    return y.reshape(B, oh, ow, -1)


def conv_bn(x, p, stride, padding, relu, residual=None, out_dtype=jnp.bfloat16):
    return _conv_bn_impl(x, p["w"], p["bias"], residual,
                         kh=p["kh"], kw=p["kw"], stride=stride, padding=padding,
                         relu=relu, out_dtype=out_dtype)


def basic_block(x, p):
    s = p["stride"]
    out = conv_bn(x, p["conv1"], stride=s, padding=1, relu=True)
    if "downsample" in p:
        identity = conv_bn(x, p["downsample"], stride=s, padding=0, relu=False)
    else:
        identity = x
    # relu(bn2(conv2(out)) + identity) — residual add fused into the matmul epilogue
    return conv_bn(out, p["conv2"], stride=1, padding=1, relu=True, residual=identity)


def resnet34_center_forward(images_nchw, params):
    x = jnp.transpose(images_nchw, (0, 2, 3, 1)).astype(jnp.bfloat16)   # NCHW -> NHWC bf16
    x = conv_bn(x, params["conv1"], stride=2, padding=3, relu=True)
    x = maxpool_3x3_s2_p1(x)
    for layer in ("layer1", "layer2", "layer3", "layer4"):
        for bp in params[layer]:
            x = basic_block(x, bp)
    feat = jnp.mean(x.astype(jnp.float32), axis=(1, 2))                 # avg pool -> (B, 512)
    # fc + BatchNorm1d + F.normalize(p=2, dim=1) fused into one Pallas kernel
    return fc_embed_l2(feat, params["fc_w"], params["fc_bias"])


def resnet34_center_forward_training(images_nchw, params):
    emb = resnet34_center_forward(images_nchw, params)
    logits = fused_matmul(emb.astype(jnp.bfloat16), params["cls_w"], params["cls_b"],
                          relu=False, out_dtype=jnp.float32)
    return emb, logits[:, :params["num_classes"]]


# ----------------------------------------------------------------------------
if __name__ == "__main__":
    key = jax.random.PRNGKey(0)
    pkey, xkey = jax.random.split(key)

    num_classes, emb_dim = 10, 256
    params = init_resnet34_center_params(pkey, num_classes=num_classes,
                                         embedding_dimension=emb_dim)
    images = jax.random.normal(xkey, (2, 3, 16, 16), jnp.float32)   # small NCHW input

    emb = resnet34_center_forward(images, params)
    emb = jax.block_until_ready(emb)

    assert emb.shape == (2, emb_dim)
    assert bool(jnp.all(jnp.isfinite(emb)))
    norms = jnp.linalg.norm(emb, axis=1)
    assert bool(jnp.allclose(norms, 1.0, atol=1e-4)), norms

    emb_t, logits = resnet34_center_forward_training(images, params)
    jax.block_until_ready(logits)
    assert logits.shape == (2, num_classes)
    assert bool(jnp.all(jnp.isfinite(logits)))

    print("KERNEL_OK")
</pallas_src>

<mosaic_0001>
module attributes {stable_mosaic.version = 11 : i64} {
  func.func @_mm_bias_act_kernel(%arg0: i32, %arg1: i32, %arg2: memref<128x256xbf16, #tpu.memory_space<vmem>>, %arg3: memref<256x128xbf16, #tpu.memory_space<vmem>>, %arg4: memref<1x128xf32, #tpu.memory_space<vmem>>, %arg5: memref<128x128xbf16, #tpu.memory_space<vmem>>) attributes {dimension_semantics = [#tpu.dimension_semantics<parallel>, #tpu.dimension_semantics<parallel>], iteration_bounds = array<i64: 1, 1>, scalar_prefetch = 0 : i64, scratch_operands = 0 : i64, tpu.core_type = #tpu.core_type<tc>, window_params = [{transform_indices = @transform_0, window_bounds = array<i64: 128, 256>}, {transform_indices = @transform_1, window_bounds = array<i64: 256, 128>}, {transform_indices = @transform_2, window_bounds = array<i64: 1, 128>}, {transform_indices = @transform_3, window_bounds = array<i64: 128, 128>}]} {
    %c0 = arith.constant 0 : index
    %c0_0 = arith.constant 0 : index
    %0 = vector.load %arg2[%c0, %c0_0] : memref<128x256xbf16, #tpu.memory_space<vmem>>, vector<128x256xbf16>
    %c0_1 = arith.constant 0 : index
    %c0_2 = arith.constant 0 : index
    %1 = vector.load %arg3[%c0_1, %c0_2] : memref<256x128xbf16, #tpu.memory_space<vmem>>, vector<256x128xbf16>
    %cst = arith.constant dense<0.000000e+00> : vector<128x128xf32>
    %2 = tpu.matmul %0, %1, %cst {dimension_numbers = #tpu.dot_dimension_numbers<[1], [0], [0], [1], [0, 0, 1, 1], [], []>} : vector<128x256xbf16>, vector<256x128xbf16>, vector<128x128xf32> -> vector<128x128xf32>
    %c0_3 = arith.constant 0 : index
    %c0_4 = arith.constant 0 : index
    %3 = vector.load %arg4[%c0_3, %c0_4] : memref<1x128xf32, #tpu.memory_space<vmem>>, vector<1x128xf32>
    %4 = vector.broadcast %3 : vector<1x128xf32> to vector<128x128xf32>
    %5 = arith.addf %2, %4 : vector<128x128xf32>
    %cst_5 = arith.constant 0.000000e+00 : f32
    %6 = vector.broadcast %cst_5 : f32 to vector<128x128xf32>
    %7 = arith.maximumf %5, %6 : vector<128x128xf32>
    %8 = arith.truncf %7 : vector<128x128xf32> to vector<128x128xbf16>
    %c0_6 = arith.constant 0 : index
    %c0_7 = arith.constant 0 : index
    %9 = vector.load %arg5[%c0_6, %c0_7] : memref<128x128xbf16, #tpu.memory_space<vmem>>, vector<128x128xbf16>
    tpu.vector_store %arg5[%c0_6, %c0_7], %8 {strides = array<i32>} : memref<128x128xbf16, #tpu.memory_space<vmem>>, vector<128x128xbf16>,
    return
  }
  func.func @transform_0(%arg0: i32, %arg1: i32) -> (i32, i32) {
    %c0_i32 = arith.constant 0 : i32
    %c0_i32_0 = arith.constant 0 : i32
    return %arg0, %c0_i32 : i32, i32
  }
  func.func @transform_1(%arg0: i32, %arg1: i32) -> (i32, i32) {
    %c0_i32 = arith.constant 0 : i32
    %c0_i32_0 = arith.constant 0 : i32
    return %c0_i32, %arg1 : i32, i32
  }
  func.func @transform_2(%arg0: i32, %arg1: i32) -> (i32, i32) {
    %c0_i32 = arith.constant 0 : i32
    %c0_i32_0 = arith.constant 0 : i32
    return %c0_i32, %arg1 : i32, i32
  }
  func.func @transform_3(%arg0: i32, %arg1: i32) -> (i32, i32) {
    %c0_i32 = arith.constant 0 : i32
    return %arg0, %arg1 : i32, i32
  }
}

</mosaic_0001>

<bundles_post_ra>
// kernel: fused_matmul.1
= control target key start
LH: loop header
LB: loop body
LE: loop exit
PB: predicated region body
PF: predicated region fallthrough
CT: control target
= control target key end

     0   :  { %8 = vsyncpa [#allocation3], 0  ;;  %s813_s0 = inlined_call_operand.hbm [shape: bf16[128,256], index: 0, kind: input, shape index: {}]   ;;  %s814_s1 = inlined_call_operand.hbm [shape: bf16[256,128], index: 1, kind: input, shape index: {}]   ;;  %s815_s2 = inlined_call_operand.vmem [shape: f32[1,128], index: 2, kind: input, shape index: {}]   ;;  %s816_s3 = inlined_call_operand.hbm [shape: bf16[128,128], index: 3, kind: output, shape index: {}]  }
   0x1   :  { %9 = vsyncpa [#allocation6], 0 }
   0x2   :  { %10 = vsyncpa [#allocation4], 0  ;;  %s15_s14 = sshll.u32 %s813_s0, 4  ;;  %s750_s15 = smov [#allocation2]   ;;  %s16_s14 = int_to_ptr.hbm [resolvable:$true] %s15_s14 }
   0x3   :  { %s17_s16 = sshll.u32 %s750_s15, 4  ;;  %s28_s19 = sshll.u32 %s814_s1, 4  ;;  %s18_s16 = int_to_ptr.vmem [resolvable:$true] %s17_s16  ;;  %s29_s19 = int_to_ptr.hbm [resolvable:$true] %s28_s19 }
   0x4   :  { %s751_s20 = smov 128   ;;  %s752_s21 = smov 8  }
   0x5   :  { %23 = dma.hbm_to_vmem [thread:$0]  %s16_s14, 2048, %s18_s16, [#allocation3], %s751_s20, %s751_s20, %s752_s21  }
   0x6   :  { %s753_s22 = smov [#allocation5]   ;;  %s754_s24 = smov 64  }
   0x7   :  { %s30_s23 = sshll.u32 %s753_s22, 4  ;;  %s755_s25 = smov 4   ;;  %s31_s23 = int_to_ptr.vmem [resolvable:$true] %s30_s23 }
   0x8   :  { %36 = dma.hbm_to_vmem [thread:$0]  %s29_s19, 2048, %s31_s23, [#allocation6], %s754_s24, %s754_s24, %s755_s25  }
   0x9   :  { %744 = dma.done.wait [#allocation3], 2048  }
   0xa   :  { %745 = vsyncadd [#allocation3], 4294965248 }
   0xb   :  { %746 = dma.done.wait [#allocation6], 2048  }
   0xc   :  { %747 = vsyncadd [#allocation6], 4294965248  ;;  %v592_v0 = vld [vmem:[#allocation5 + $0x38] sm:$0xff]  ;;  %v591_v2 = vld [vmem:[#allocation5 + $0x30] sm:$0xff]  ;;  %s427_s29 = sshll.u32 %s816_s3, 4  ;;  %s428_s29 = int_to_ptr.hbm [resolvable:$true] %s427_s29 }
   0xd   :  { %v600_v1 = vld [vmem:[#allocation5 + $0x78] sm:$0xff]  ;;  %275 = vmatpush.bf16.msra.mxu0 %v592_v0  ;;  %648 = vmatpush.bf16.msra.mxu2 %v592_v0  ;;  %v599_v3 = vld [vmem:[#allocation5 + $0x70] sm:$0xff]  ;;  %v590_v4 = vld [vmem:[#allocation5 + $0x28] sm:$0xff] }
   0xe   :  { %324 = vmatpush.bf16.msra.mxu1 %v600_v1  ;;  %656 = vmatpush.bf16.msra.mxu3 %v600_v1  ;;  %v598_v5 = vld [vmem:[#allocation5 + $0x68] sm:$0xff]  ;;  %v589_v6 = vld [vmem:[#allocation5 + $0x20] sm:$0xff]  ;;  %v588_v8 = vld [vmem:[#allocation5 + $0x18] sm:$0xff] }
   0xf   :  { %v597_v7 = vld [vmem:[#allocation5 + $0x60] sm:$0xff]  ;;  %v596_v9 = vld [vmem:[#allocation5 + $0x58] sm:$0xff]  ;;  %v587_v10 = vld [vmem:[#allocation5 + $0x10] sm:$0xff] }
  0x10   :  { %v595_v11 = vld [vmem:[#allocation5 + $0x50] sm:$0xff]  ;;  %v586_v12 = vld [vmem:[#allocation5 + $0x8] sm:$0xff]  ;;  %v585_v14 = vld [vmem:[#allocation5] sm:$0xff] }
  0x11   :  { %276 = vmatpush.bf16.msra.mxu0 %v591_v2  ;;  %649 = vmatpush.bf16.msra.mxu2 %v591_v2  ;;  %v594_v13 = vld [vmem:[#allocation5 + $0x48] sm:$0xff]  ;;  %v593_v15 = vld [vmem:[#allocation5 + $0x40] sm:$0xff]  ;;  %v451_v28 = vld [vmem:[#allocation2 + $0x10] sm:$0xf] }
  0x12   :  { %325 = vmatpush.bf16.msra.mxu1 %v599_v3  ;;  %657 = vmatpush.bf16.msra.mxu3 %v599_v3  ;;  %v443_v16 = vld [vmem:[#allocation2] sm:$0xf]  ;;  %v570_v17 = vld [vmem:[#allocation2 + $0x4] sm:$0xf0]  ;;  %v569_v20 = vld [vmem:[#allocation2 + $0x4] sm:$0xf] }
  0x13   :  { %v475_v18 = vld [vmem:[#allocation2 + $0x40] sm:$0xf]  ;;  %v578_v19 = vld [vmem:[#allocation2 + $0x44] sm:$0xf0]  ;;  %v445_v21 = vld [vmem:[#allocation2 + $0x8] sm:$0xf0]  ;;  %v444_v24 = vor.u32 %v570_v17, %v443_v16 }
  0x14   :  { %v577_v22 = vld [vmem:[#allocation2 + $0x44] sm:$0xf]  ;;  %v477_v23 = vld [vmem:[#allocation2 + $0x48] sm:$0xf0]  ;;  %v476_v25 = vor.u32 %v578_v19, %v475_v18  ;;  %v448_v26 = vor.u32 %v569_v20, %v445_v21  ;;  %v572_v29 = vld [vmem:[#allocation2 + $0x14] sm:$0xf0] }
  0x15   :  { %277 = vmatpush.bf16.msra.mxu0 %v590_v4  ;;  %650 = vmatpush.bf16.msra.mxu2 %v590_v4  ;;  %v480_v27 = vor.u32 %v577_v22, %v477_v23  ;;  %v483_v30 = vld [vmem:[#allocation2 + $0x50] sm:$0xf]  ;;  %v580_v31 = vld [vmem:[#allocation2 + $0x54] sm:$0xf0]  ;;  %v571_v32 = vld [vmem:[#allocation2 + $0x14] sm:$0xf]  ;;  %v452_v36 = vor.u32 %v572_v29, %v451_v28 }
  0x16   :  { %326 = vmatpush.bf16.msra.mxu1 %v598_v5  ;;  %658 = vmatpush.bf16.msra.mxu3 %v598_v5  ;;  %v453_v33 = vld [vmem:[#allocation2 + $0x18] sm:$0xf0]  ;;  %v579_v34 = vld [vmem:[#allocation2 + $0x54] sm:$0xf]  ;;  %v484_v37 = vor.u32 %v580_v31, %v483_v30  ;;  %v459_v40 = vld [vmem:[#allocation2 + $0x20] sm:$0xf] }
  0x17   :  { %v485_v35 = vld [vmem:[#allocation2 + $0x58] sm:$0xf0]  ;;  %v456_v38 = vor.u32 %v571_v32, %v453_v33  ;;  %v574_v41 = vld [vmem:[#allocation2 + $0x24] sm:$0xf0]  ;;  %v491_v42 = vld [vmem:[#allocation2 + $0x60] sm:$0xf] }
  0x18   :  { %v488_v39 = vor.u32 %v579_v34, %v485_v35  ;;  %v582_v43 = vld [vmem:[#allocation2 + $0x64] sm:$0xf0]  ;;  %v573_v44 = vld [vmem:[#allocation2 + $0x24] sm:$0xf]  ;;  %v461_v45 = vld [vmem:[#allocation2 + $0x28] sm:$0xf0]  ;;  %v460_v48 = vor.u32 %v574_v41, %v459_v40 }
  0x19   :  { %278 = vmatpush.bf16.msra.mxu0 %v589_v6  ;;  %651 = vmatpush.bf16.msra.mxu2 %v589_v6  ;;  %v581_v46 = vld [vmem:[#allocation2 + $0x64] sm:$0xf]  ;;  %v493_v47 = vld [vmem:[#allocation2 + $0x68] sm:$0xf0]  ;;  %v492_v49 = vor.u32 %v582_v43, %v491_v42  ;;  %v464_v50 = vor.u32 %v573_v44, %v461_v45  ;;  %v467_v52 = vld [vmem:[#allocation2 + $0x30] sm:$0xf] }
  0x1a   :  { %327 = vmatpush.bf16.msra.mxu1 %v597_v7  ;;  %659 = vmatpush.bf16.msra.mxu3 %v597_v7  ;;  %v496_v51 = vor.u32 %v581_v46, %v493_v47  ;;  %v576_v53 = vld [vmem:[#allocation2 + $0x34] sm:$0xf0]  ;;  %v499_v54 = vld [vmem:[#allocation2 + $0x70] sm:$0xf]  ;;  %v575_v56 = vld [vmem:[#allocation2 + $0x34] sm:$0xf] }
  0x1b   :  { %v584_v55 = vld [vmem:[#allocation2 + $0x74] sm:$0xf0]  ;;  %v469_v57 = vld [vmem:[#allocation2 + $0x38] sm:$0xf0]  ;;  %v583_v58 = vld [vmem:[#allocation2 + $0x74] sm:$0xf]  ;;  %v468_v60 = vor.u32 %v576_v53, %v467_v52 }
  0x1c   :  { %v501_v59 = vld [vmem:[#allocation2 + $0x78] sm:$0xf0]  ;;  %v500_v61 = vor.u32 %v584_v55, %v499_v54  ;;  %v472_v62 = vor.u32 %v575_v56, %v469_v57  ;;  %v789_v1 = vld [vmem:[%s815_s2] ss:$0 sm:$0xff]  ;;  %s756_s2 = smov [#allocation7]  }
  0x1d   :  { %279 = vmatpush.bf16.msra.mxu0 %v588_v8  ;;  %652 = vmatpush.bf16.msra.mxu2 %v588_v8  ;;  %v504_v63 = vor.u32 %v583_v58, %v501_v59  ;;  %s425_s26 = sshll.u32 %s756_s2, 4  ;;  %s426_s26 = int_to_ptr.vmem [resolvable:$true] %s425_s26 }
  0x1e   :  { %328 = vmatpush.bf16.msra.mxu1 %v596_v9  ;;  %660 = vmatpush.bf16.msra.mxu3 %v596_v9 }
  0x21   :  { %280 = vmatpush.bf16.msra.mxu0 %v587_v10  ;;  %653 = vmatpush.bf16.msra.mxu2 %v587_v10 }
  0x22   :  { %329 = vmatpush.bf16.msra.mxu1 %v595_v11  ;;  %661 = vmatpush.bf16.msra.mxu3 %v595_v11 }
  0x25   :  { %281 = vmatpush.bf16.msra.mxu0 %v586_v12  ;;  %654 = vmatpush.bf16.msra.mxu2 %v586_v12 }
  0x26   :  { %330 = vmatpush.bf16.msra.mxu1 %v594_v13  ;;  %662 = vmatpush.bf16.msra.mxu3 %v594_v13 }
  0x29   :  { %282 = vmatpush.bf16.msra.mxu0 %v585_v14  ;;  %655 = vmatpush.bf16.msra.mxu2 %v585_v14 }
  0x2a   :  { %331 = vmatpush.bf16.msra.mxu1 %v593_v15  ;;  %663 = vmatpush.bf16.msra.mxu3 %v593_v15 }
  0x2c   :  { %283 = vmatmul.bf16.vlgmr.msra.gmra.mxu0 %v444_v24  ;;  %303 = vmatmul.bf16.vlgmr.msra.gmra.mxu2 %v476_v25 }
  0x2d   :  { %332 = vmatmul.bf16.vlgmr.msra.gmra.mxu1 %v448_v26  ;;  %352 = vmatmul.bf16.vlgmr.msra.gmra.mxu3 %v480_v27 }
  0x3c   :  { %288 = vmatmul.bf16.gmra.mxu0 %v452_v36  ;;  %308 = vmatmul.bf16.gmra.mxu2 %v484_v37 }
  0x3d   :  { %337 = vmatmul.bf16.gmra.mxu1 %v456_v38  ;;  %357 = vmatmul.bf16.gmra.mxu3 %v488_v39 }
  0x4c   :  { %293 = vmatmul.bf16.gmra.mxu0 %v460_v48  ;;  %313 = vmatmul.bf16.gmra.mxu2 %v492_v49 }
  0x4d   :  { %342 = vmatmul.bf16.gmra.mxu1 %v464_v50  ;;  %362 = vmatmul.bf16.gmra.mxu3 %v496_v51 }
  0x5c   :  { %298 = vmatmul.bf16.gmra.mxu0 %v468_v60  ;;  %318 = vmatmul.bf16.gmra.mxu2 %v500_v61 }
  0x5d   :  { %347 = vmatmul.bf16.gmra.mxu1 %v472_v62  ;;  %367 = vmatmul.bf16.gmra.mxu3 %v504_v63 }
  0xa9   :  { %v284_v0 = vpop.f32.mrf.mxu0 }
  0xaa   :  { %v333_v2 = vpop.f32.mrf.mxu1  ;;  %v285_v3 = vadd.f32 %v789_v1, %v284_v0 }
  0xac   :  { %v334_v7 = vadd.f32 %v333_v2, %v285_v3 }
  0xae   :  { %v373_v12 = vmax.f32 %v334_v7, 0.0 }
  0xaf   :  { %v304_v4 = vpop.f32.mrf.mxu2 }
  0xb0   :  { %v353_v5 = vpop.f32.mrf.mxu3  ;;  %v305_v10 = vadd.f32 %v789_v1, %v304_v4 }
  0xb1   :  { %v286_v6 = vpop.f32.mrf.mxu0 }
  0xb2   :  { %v287_v8 = vadd.f32 %v789_v1, %v286_v6  ;;  %v335_v9 = vpop.f32.mrf.mxu1  ;;  %v354_v15 = vadd.f32 %v353_v5, %v305_v10 }
  0xb4   :  { %v336_v11 = vadd.f32 %v335_v9, %v287_v8  ;;  %v381_v22 = vmax.f32 %v354_v15, 0.0 }
  0xb6   :  { %v374_v13 = vmax.f32 %v336_v11, 0.0 }
  0xb7   :  { %v306_v14 = vpop.f32.mrf.mxu2 }
  0xb8   :  { %v604_v16 = vpack.c.bf16 %v374_v13, %v373_v12  ;;  %v307_v17 = vadd.f32 %v789_v1, %v306_v14  ;;  %v355_v18 = vpop.f32.mrf.mxu3 }
  0xb9   :  { %v289_v19 = vpop.f32.mrf.mxu0 }
  0xba   :  { %605 = vst [vmem:[#allocation7] sm:$0xff] %v604_v16   ;;  %v356_v20 = vadd.f32 %v355_v18, %v307_v17  ;;  %v338_v21 = vpop.f32.mrf.mxu1  ;;  %v290_v25 = vadd.f32 %v789_v1, %v289_v19 }
  0xbc   :  { %v382_v23 = vmax.f32 %v356_v20, 0.0  ;;  %v339_v29 = vadd.f32 %v338_v21, %v290_v25 }
  0xbe   :  { %v624_v24 = vpack.c.bf16 %v382_v23, %v381_v22  ;;  %v375_v34 = vmax.f32 %v339_v29, 0.0 }
  0xbf   :  { %v309_v26 = vpop.f32.mrf.mxu2 }
  0xc0   :  { %644 = vst [vmem:[#allocation7 + $0x20] sm:$0xff] %v624_v24   ;;  %v358_v27 = vpop.f32.mrf.mxu3  ;;  %v310_v32 = vadd.f32 %v789_v1, %v309_v26 }
  0xc1   :  { %v291_v28 = vpop.f32.mrf.mxu0 }
  0xc2   :  { %v292_v30 = vadd.f32 %v789_v1, %v291_v28  ;;  %v340_v31 = vpop.f32.mrf.mxu1  ;;  %v359_v37 = vadd.f32 %v358_v27, %v310_v32 }
  0xc4   :  { %v341_v33 = vadd.f32 %v340_v31, %v292_v30  ;;  %v383_v44 = vmax.f32 %v359_v37, 0.0 }
  0xc6   :  { %v376_v35 = vmax.f32 %v341_v33, 0.0 }
  0xc7   :  { %v311_v36 = vpop.f32.mrf.mxu2 }
  0xc8   :  { %v609_v38 = vpack.c.bf16 %v376_v35, %v375_v34  ;;  %v312_v39 = vadd.f32 %v789_v1, %v311_v36  ;;  %v360_v40 = vpop.f32.mrf.mxu3 }
  0xc9   :  { %v294_v41 = vpop.f32.mrf.mxu0 }
  0xca   :  { %641 = vst [vmem:[#allocation7 + $0x8] sm:$0xff] %v609_v38   ;;  %v361_v42 = vadd.f32 %v360_v40, %v312_v39  ;;  %v343_v43 = vpop.f32.mrf.mxu1  ;;  %v295_v47 = vadd.f32 %v789_v1, %v294_v41 }
  0xcc   :  { %v384_v45 = vmax.f32 %v361_v42, 0.0  ;;  %v344_v51 = vadd.f32 %v343_v43, %v295_v47 }
  0xce   :  { %v629_v46 = vpack.c.bf16 %v384_v45, %v383_v44  ;;  %v377_v56 = vmax.f32 %v344_v51, 0.0 }
  0xcf   :  { %v314_v48 = vpop.f32.mrf.mxu2 }
  0xd0   :  { %645 = vst [vmem:[#allocation7 + $0x28] sm:$0xff] %v629_v46   ;;  %v363_v49 = vpop.f32.mrf.mxu3  ;;  %v315_v54 = vadd.f32 %v789_v1, %v314_v48 }
  0xd1   :  { %v296_v50 = vpop.f32.mrf.mxu0 }
  0xd2   :  { %v297_v52 = vadd.f32 %v789_v1, %v296_v50  ;;  %v345_v53 = vpop.f32.mrf.mxu1  ;;  %v364_v59 = vadd.f32 %v363_v49, %v315_v54 }
  0xd4   :  { %v346_v55 = vadd.f32 %v345_v53, %v297_v52  ;;  %v385_v3 = vmax.f32 %v364_v59, 0.0 }
  0xd6   :  { %v378_v57 = vmax.f32 %v346_v55, 0.0 }
  0xd7   :  { %v316_v58 = vpop.f32.mrf.mxu2 }
  0xd8   :  { %v614_v60 = vpack.c.bf16 %v378_v57, %v377_v56  ;;  %v317_v61 = vadd.f32 %v789_v1, %v316_v58  ;;  %v365_v62 = vpop.f32.mrf.mxu3 }
  0xd9   :  { %v299_v63 = vpop.f32.mrf.mxu0 }
  0xda   :  { %642 = vst [vmem:[#allocation7 + $0x10] sm:$0xff] %v614_v60   ;;  %v366_v0 = vadd.f32 %v365_v62, %v317_v61  ;;  %v348_v2 = vpop.f32.mrf.mxu1  ;;  %v300_v6 = vadd.f32 %v789_v1, %v299_v63 }
  0xdc   :  { %v386_v4 = vmax.f32 %v366_v0, 0.0  ;;  %v349_v10 = vadd.f32 %v348_v2, %v300_v6 }
  0xde   :  { %v634_v5 = vpack.c.bf16 %v386_v4, %v385_v3  ;;  %v379_v15 = vmax.f32 %v349_v10, 0.0 }
  0xdf   :  { %v319_v7 = vpop.f32.mrf.mxu2 }
  0xe0   :  { %646 = vst [vmem:[#allocation7 + $0x30] sm:$0xff] %v634_v5   ;;  %v368_v8 = vpop.f32.mrf.mxu3  ;;  %v320_v13 = vadd.f32 %v789_v1, %v319_v7 }
  0xe1   :  { %v301_v9 = vpop.f32.mrf.mxu0 }
  0xe2   :  { %v302_v11 = vadd.f32 %v789_v1, %v301_v9  ;;  %v350_v12 = vpop.f32.mrf.mxu1  ;;  %v369_v18 = vadd.f32 %v368_v8, %v320_v13 }
  0xe4   :  { %v351_v14 = vadd.f32 %v350_v12, %v302_v11  ;;  %v387_v23 = vmax.f32 %v369_v18, 0.0 }
  0xe6   :  { %v380_v16 = vmax.f32 %v351_v14, 0.0 }
  0xe7   :  { %v321_v17 = vpop.f32.mrf.mxu2 }
  0xe8   :  { %v619_v19 = vpack.c.bf16 %v380_v16, %v379_v15  ;;  %v322_v20 = vadd.f32 %v789_v1, %v321_v17  ;;  %v370_v21 = vpop.f32.mrf.mxu3 }
  0xea   :  { %643 = vst [vmem:[#allocation7 + $0x18] sm:$0xff] %v619_v19   ;;  %v371_v22 = vadd.f32 %v370_v21, %v322_v20 }
  0xec   :  { %v388_v24 = vmax.f32 %v371_v22, 0.0 }
  0xee   :  { %v639_v25 = vpack.c.bf16 %v388_v24, %v387_v23 }
  0xf0   :  { %647 = vst [vmem:[#allocation7 + $0x38] sm:$0xff] %v639_v25  }
  0xf1   :  { %433 = dma.vmem_to_hbm [thread:$0]  %s426_s26, 1024, %s428_s29, [#allocation4], %s754_s24, %s754_s24, %s755_s25  }
  0xf2   :  { %748 = dma.done.wait [#allocation4], 1024  }
  0xf3   :  { %749 = vsyncadd [#allocation4], 4294966272 }
  0xf4   :  { %438 = vsyncpa [#allocation3], 1 }
  0xf5   :  { %439 = vsyncpa [#allocation6], 1 }
  0xf6   :  { %440 = vsyncpa [#allocation4], 1 }

</bundles_post_ra>
